<compile_context>
chip_gen: v7x
topology: tpu7x:2x2x1
jax: 0.10.0
libtpu: 0.0.40
codegen_flags: <defaults>
</compile_context>

<pallas_src>
import functools

import jax
import jax.numpy as jnp
from jax.experimental import pallas as pl
from jax.experimental.pallas import tpu as pltpu


_DEFAULT_BLOCK_ROWS = 512   # sweet spot from measured tile sweeps (256-1024)


def _unpool_kernel(inv_ref, x_ref, out_ref):
    """Produce one (bm, D) block of new_X.

    inv_ref: VMEM (bm, 1) int32.  inv[n] = j + 1 if idx[j] == n, else 0
             (0 => output row n stays zero).
    x_ref:   VMEM (K, D) pooled node features, resident across all grid steps.
    out_ref: VMEM (bm, D) output rows [i*bm, (i+1)*bm).
    """
    inv = inv_ref[...]                                    # (bm, 1) int32
    src = inv - 1                                         # -1 => "stays zero"
    bm = out_ref.shape[0]
    k = x_ref.shape[0]
    # One-hot row selector fed to the (otherwise idle) MXU.  Rows with
    # src == -1 match no column -> exact zeros for unselected rows.
    cols = jax.lax.broadcasted_iota(jnp.int32, (bm, k), 1)
    one_hot = (cols == src).astype(x_ref.dtype)           # (bm, K)
    blk = jnp.dot(one_hot, x_ref[...], preferred_element_type=jnp.float32)
    out_ref[...] = blk.astype(out_ref.dtype)               # single dense store


def graph_unpool(A, X, idx, *, block_rows=_DEFAULT_BLOCK_ROWS,
                 single_buffer_x=True):
    """Pallas implementation of GraphUnpool.forward(A, X, idx)."""
    N = A.shape[0]
    K, D = X.shape
    itemsize = jnp.dtype(X.dtype).itemsize

    # Large, sublane-aligned output row blocks (amortise per-step overhead),
    # clamped for small graphs.
    bm = min(block_rows, 8 * pl.cdiv(N, 8))
    n_blocks = pl.cdiv(N, bm)
    n_pad = bm * n_blocks

    # O(N) integer glue (XLA): invert idx -> per-output-row source row (+1;
    # 0 means "not selected, stays zero").  Assumes idx is unique and in
    # [0, N); duplicates keep the last writer (like torch's in-place assign).
    inv = (
        jnp.zeros((n_pad,), jnp.int32)
        .at[idx.astype(jnp.int32)]
        .set(jnp.arange(1, K + 1, dtype=jnp.int32))
    ).reshape(n_pad, 1)

    # X's block index is constant across the grid; double buffering it is pure
    # VMEM waste (matters on v7x: 64 MiB/TC).  If this jax version rejects
    # pipeline_mode, the caller retries with single_buffer_x=False.
    if single_buffer_x:
        x_spec = pl.BlockSpec((K, D), lambda i: (0, 0),
                              pipeline_mode=pl.Buffered(1))
    else:
        x_spec = pl.BlockSpec((K, D), lambda i: (0, 0))

    # VMEM budget: X (worst case double buffered) + double-buffered output
    # block + inv blocks, plus headroom for compiler-internal scratch.
    vmem_need = (2 * K * D * itemsize
                 + 2 * bm * D * itemsize
                 + 2 * bm * 4
                 + (4 << 20))
    vmem_limit = int(min(max(vmem_need, 32 << 20), 64 << 20))  # ok on v5e/v6e/v7x

    new_x = pl.pallas_call(
        _unpool_kernel,
        out_shape=jax.ShapeDtypeStruct((N, D), X.dtype),  # exact (N, D); the
        grid_spec=pl.GridSpec(                            # partial last block is
            grid=(n_blocks,),                             # masked by Pallas.
            in_specs=[
                pl.BlockSpec((bm, 1), lambda i: (i, 0)),  # inv rows for block i
                x_spec,                                   # X resident in VMEM
            ],
            out_specs=pl.BlockSpec((bm, D), lambda i: (i, 0)),
        ),
        compiler_params=pltpu.CompilerParams(
            dimension_semantics=("parallel",),            # megacore-shardable
            vmem_limit_bytes=vmem_limit,
        ),
        cost_estimate=pl.CostEstimate(
            flops=2 * n_pad * K * D,                      # one-hot matmul
            transcendentals=0,
            bytes_accessed=int(N * D * itemsize + K * D * itemsize + n_pad * 4),
        ),
    )(inv, X)

    # A is passed through unchanged (the module returns it as-is).
    return A, new_x


if __name__ == "__main__":
    key = jax.random.PRNGKey(0)
    k1, k2 = jax.random.split(key)

    def run(kwargs, A, X, idx):
        out = jax.jit(functools.partial(graph_unpool, **kwargs))(A, X, idx)
        jax.block_until_ready(out)
        return out

    def check(kwargs, n, k, d, seed_key):
        kA, kX, kI = jax.random.split(seed_key, 3)
        A = jax.random.normal(kA, (n, n), dtype=jnp.float32)
        A = 0.5 * (A + A.T)                                     # symmetric adj.
        X = jax.random.normal(kX, (k, d), dtype=jnp.float32)    # pooled features
        idx = jax.random.permutation(kI, n)[:k].astype(jnp.int32)
        A_out, new_X = run(kwargs, A, X, idx)
        ref = jnp.zeros((n, d), jnp.float32).at[idx].set(X)     # torch semantics
        assert A_out.shape == (n, n) and new_X.shape == (n, d)
        assert jnp.allclose(A_out, A)
        assert jnp.allclose(new_X, ref, atol=1e-6)

    # Prefer the single-buffered-X spec; fall back if this jax version does not
    # support pipeline_mode on pallas_call BlockSpecs.
    kwargs = {}
    try:
        check(kwargs, n=32, k=16, d=128, seed_key=k1)
    except Exception:
        kwargs = {"single_buffer_x": False}
        check(kwargs, n=32, k=16, d=128, seed_key=k1)

    # Larger case: two 512-row blocks with a masked partial final block.
    check(kwargs, n=1000, k=64, d=256, seed_key=k2)

    print("KERNEL_OK")
</pallas_src>

<mosaic_0001>
module attributes {stable_mosaic.version = 11 : i64} {
  func.func @_unpool_kernel(%arg0: i32, %arg1: memref<32x1xi32, #tpu.memory_space<vmem>>, %arg2: memref<16x128xf32, #tpu.memory_space<vmem>>, %arg3: memref<32x128xf32, #tpu.memory_space<vmem>>) attributes {dimension_semantics = [#tpu.dimension_semantics<parallel>], iteration_bounds = array<i64: 1>, scalar_prefetch = 0 : i64, scratch_operands = 0 : i64, tpu.core_type = #tpu.core_type<tc>, window_params = [{transform_indices = @transform_0, window_bounds = array<i64: 32, 1>}, {pipeline_mode = #tpu.pipeline_mode<synchronous>, transform_indices = @transform_1, window_bounds = array<i64: 16, 128>}, {transform_indices = @transform_2, window_bounds = array<i64: 32, 128>}]} {
    %c0 = arith.constant 0 : index
    %c0_0 = arith.constant 0 : index
    %0 = vector.load %arg1[%c0, %c0_0] : memref<32x1xi32, #tpu.memory_space<vmem>>, vector<32x1xi32>
    %c1_i32 = arith.constant 1 : i32
    %1 = vector.broadcast %c1_i32 : i32 to vector<32x1xi32>
    %2 = arith.subi %0, %1 : vector<32x1xi32>
    %3 = tpu.iota {dimensions = array<i32: 1>} : vector<32x16xi32>
    %4 = vector.broadcast %2 : vector<32x1xi32> to vector<32x16xi32>
    %5 = arith.cmpi eq, %3, %4 : vector<32x16xi32>
    %6 = arith.extui %5 : vector<32x16xi1> to vector<32x16xi32>
    %7 = arith.sitofp %6 : vector<32x16xi32> to vector<32x16xf32>
    %c0_1 = arith.constant 0 : index
    %c0_2 = arith.constant 0 : index
    %8 = vector.load %arg2[%c0_1, %c0_2] : memref<16x128xf32, #tpu.memory_space<vmem>>, vector<16x128xf32>
    %cst = arith.constant dense<0.000000e+00> : vector<32x128xf32>
    %9 = tpu.matmul %7, %8, %cst {dimension_numbers = #tpu.dot_dimension_numbers<[1], [0], [0], [1], [0, 0, 1, 1], [], []>} : vector<32x16xf32>, vector<16x128xf32>, vector<32x128xf32> -> vector<32x128xf32>
    %c0_3 = arith.constant 0 : index
    %c0_4 = arith.constant 0 : index
    %10 = vector.load %arg3[%c0_3, %c0_4] : memref<32x128xf32, #tpu.memory_space<vmem>>, vector<32x128xf32>
    tpu.vector_store %arg3[%c0_3, %c0_4], %9 {strides = array<i32>} : memref<32x128xf32, #tpu.memory_space<vmem>>, vector<32x128xf32>,
    return
  }
  func.func @transform_0(%arg0: i32) -> (i32, i32) {
    %c0_i32 = arith.constant 0 : i32
    %c0_i32_0 = arith.constant 0 : i32
    return %arg0, %c0_i32 : i32, i32
  }
  func.func @transform_1(%arg0: i32) -> (i32, i32) {
    %c0_i32 = arith.constant 0 : i32
    %c0_i32_0 = arith.constant 0 : i32
    %c0_i32_1 = arith.constant 0 : i32
    return %c0_i32, %c0_i32_0 : i32, i32
  }
  func.func @transform_2(%arg0: i32) -> (i32, i32) {
    %c0_i32 = arith.constant 0 : i32
    %c0_i32_0 = arith.constant 0 : i32
    return %arg0, %c0_i32 : i32, i32
  }
}

module attributes {stable_mosaic.version = 11 : i64} {
  func.func @_unpool_kernel(%arg0: i32, %arg1: memref<32x1xi32, #tpu.memory_space<vmem>>, %arg2: memref<16x128xf32, #tpu.memory_space<vmem>>, %arg3: memref<32x128xf32, #tpu.memory_space<vmem>>) attributes {dimension_semantics = [#tpu.dimension_semantics<parallel>], iteration_bounds = array<i64: 1>, scalar_prefetch = 0 : i64, scratch_operands = 0 : i64, tpu.core_type = #tpu.core_type<tc>, window_params = [{transform_indices = @transform_0, window_bounds = array<i64: 32, 1>}, {pipeline_mode = #tpu.pipeline_mode<synchronous>, transform_indices = @transform_1, window_bounds = array<i64: 16, 128>}, {transform_indices = @transform_2, window_bounds = array<i64: 32, 128>}]} {
    %c0 = arith.constant 0 : index
    %c0_0 = arith.constant 0 : index
    %0 = vector.load %arg1[%c0, %c0_0] : memref<32x1xi32, #tpu.memory_space<vmem>>, vector<32x1xi32>
    %c1_i32 = arith.constant 1 : i32
    %1 = vector.broadcast %c1_i32 : i32 to vector<32x1xi32>
    %2 = arith.subi %0, %1 : vector<32x1xi32>
    %3 = tpu.iota {dimensions = array<i32: 1>} : vector<32x16xi32>
    %4 = vector.broadcast %2 : vector<32x1xi32> to vector<32x16xi32>
    %5 = arith.cmpi eq, %3, %4 : vector<32x16xi32>
    %6 = arith.extui %5 : vector<32x16xi1> to vector<32x16xi32>
    %7 = arith.sitofp %6 : vector<32x16xi32> to vector<32x16xf32>
    %c0_1 = arith.constant 0 : index
    %c0_2 = arith.constant 0 : index
    %8 = vector.load %arg2[%c0_1, %c0_2] : memref<16x128xf32, #tpu.memory_space<vmem>>, vector<16x128xf32>
    %cst = arith.constant dense<0.000000e+00> : vector<32x128xf32>
    %9 = tpu.matmul %7, %8, %cst {dimension_numbers = #tpu.dot_dimension_numbers<[1], [0], [0], [1], [0, 0, 1, 1], [], []>} : vector<32x16xf32>, vector<16x128xf32>, vector<32x128xf32> -> vector<32x128xf32>
    %c0_3 = arith.constant 0 : index
    %c0_4 = arith.constant 0 : index
    %10 = vector.load %arg3[%c0_3, %c0_4] : memref<32x128xf32, #tpu.memory_space<vmem>>, vector<32x128xf32>
    tpu.vector_store %arg3[%c0_3, %c0_4], %9 {strides = array<i32>} : memref<32x128xf32, #tpu.memory_space<vmem>>, vector<32x128xf32>,
    return
  }
  func.func @transform_0(%arg0: i32) -> (i32, i32) {
    %c0_i32 = arith.constant 0 : i32
    %c0_i32_0 = arith.constant 0 : i32
    return %arg0, %c0_i32 : i32, i32
  }
  func.func @transform_1(%arg0: i32) -> (i32, i32) {
    %c0_i32 = arith.constant 0 : i32
    %c0_i32_0 = arith.constant 0 : i32
    %c0_i32_1 = arith.constant 0 : i32
    return %c0_i32, %c0_i32_0 : i32, i32
  }
  func.func @transform_2(%arg0: i32) -> (i32, i32) {
    %c0_i32 = arith.constant 0 : i32
    %c0_i32_0 = arith.constant 0 : i32
    return %arg0, %c0_i32 : i32, i32
  }
}

</mosaic_0001>

<bundles_post_ra>
// kernel: graph_unpool.1
= control target key start
LH: loop header
LB: loop body
LE: loop exit
PB: predicated region body
PF: predicated region fallthrough
CT: control target
= control target key end

     0   :  { %v231_v3 = vmov 0   ;;  %s281_s0 = inlined_call_operand.vmem [shape: s32[32,1], index: 0, kind: input, shape index: {}]   ;;  %s282_s1 = inlined_call_operand.vmem [shape: f32[16,128], index: 1, kind: input, shape index: {}]   ;;  %s283_s2 = inlined_call_operand.hbm [shape: f32[32,128], index: 2, kind: output, shape index: {}]  }
   0x1   :  { %v13_v0 = vld [vmem:[%s281_s0 + $0x8] sm:$0xff]  ;;  %v12_v1 = vld [vmem:[%s281_s0] sm:$0xff]  ;;  %v15_v2 = vld [vmem:[%s281_s0 + $0x18] sm:$0xff]  ;;  %206 = vset.pattern.permute.xlu1 %v231_v3  ;;  %205 = vset.pattern.permute.xlu0 %v231_v3 }
   0x2   :  { %v167_v4 = vadd.s32 4294967295, %v13_v0  ;;  %v166_v5 = vadd.s32 4294967295, %v12_v1  ;;  %v14_v6 = vld [vmem:[%s281_s0 + $0x10] sm:$0xff]  ;;  %v46_v7 = vld [vmem:[%s282_s1] sm:$0xff]  ;;  %v47_v8 = vld [vmem:[%s282_s1 + $0x8] sm:$0xff] }
   0x3   :  { %v194_v9 = vpack.c.bf16 %v47_v8, %v46_v7 }
   0x4   :  { %7 = vsyncpa [#allocation3], 0  ;;  %26 = vperm.xlu1 %206, %v167_v4   ;;  %23 = vperm.xlu0 %205, %v166_v5   ;;  %v169_v10 = vadd.s32 4294967295, %v15_v2  ;;  %v168_v11 = vadd.s32 4294967295, %v14_v6  ;;  %v20_v12 = vlaneseq  ;;  %vm48_vm0 = vcmask 130048   ;;  %s233_s0 = smov [#allocation2]  }
   0x5   :  { %195 = vmatprep.subr.bf16.mxu0 %v194_v9  ;;  %198 = vmatprep.subr.bf16.mxu1 %v194_v9  ;;  %v232_v16 = vmov 0.0   ;;  %s155_s1 = sshll.u32 %s233_s0, 4  ;;  %s156_s1 = int_to_ptr.vmem [resolvable:$true] %s155_s1 }
   0x6   :  { %197 = vmatpush3.bf16.msra.mxu0 %v194_v9  ;;  %199 = vmatpush3.bf16.msra.mxu1 %v194_v9  ;;  %v21_v13 = vand.u32 127, %v20_v12  ;;  %s207_s21 = scalar_lea.vmem %s156_s1, 512  ;;  %p212_p1 = scmp.lt.s32.totalorder %s156_s1, %s156_s1 }
   0x7   :  { %p208_p0 = scmp.ne.s32.totalorder %s156_s1, %s207_s21  ;;  %p213_p2 = scmp.lt.s32.totalorder %s207_s21, %s207_s21 }
   0x8   :  { %32 = vperm.xlu1 %206, %v169_v10   ;;  %29 = vperm.xlu0 %205, %v168_v11  }
   0x9   :  { %p214_p3 = por %p213_p2, %p212_p1 }
   0xb   :  { %p215_p4 = pnand %p214_p3, %p208_p0 }
  0x83   :  { %v27_v14 = vpop.permute.xlu1 %26  ;;  %v24_v15 = vpop.permute.xlu0 %23 }
  0x84   :  { %vm35_vm1 = vcmp.eq.s32.totalorder %v21_v13, %v27_v14  ;;  %vm34_vm2 = vcmp.eq.s32.totalorder %v21_v13, %v24_v15 }
  0x85   :  { %v171_v17 = vsel %vm35_vm1, 1.0, %v232_v16  ;;  %v170_v18 = vsel %vm34_vm2, 1.0, %v232_v16 }
  0x86   :  { %188 = vmatprep.mubr.msk.f32.mxu0 %vm48_vm0, %v170_v18 }
  0x87   :  { %v33_v19 = vpop.permute.xlu1 %32  ;;  %189 = vmatmul.mubr.msk.f32.vlgmr.msra.gmra.mrb[0].mxu0 %vm48_vm0, %v171_v17  ;;  %v30_v20 = vpop.permute.xlu0 %29 }
  0x88   :  { %vm37_vm3 = vcmp.eq.s32.totalorder %v21_v13, %v33_v19  ;;  %vm36_vm4 = vcmp.eq.s32.totalorder %v21_v13, %v30_v20 }
  0x89   :  { %v173_v21 = vsel %vm37_vm3, 1.0, %v232_v16  ;;  %v172_v22 = vsel %vm36_vm4, 1.0, %v232_v16 }
  0x8a   :  { %191 = vmatprep.mubr.msk.f32.mxu1 %vm48_vm0, %v172_v22 }
  0x8b   :  { %192 = vmatmul.mubr.msk.f32.vlgmr.msra.gmra.mrb[0].mxu1 %vm48_vm0, %v173_v21 }
 0x15a   :  { %v190_v23 = vpop.f32.mrb[0].mxu0 }
 0x15b   :  { %147 = vst [vmem:[#allocation2 + $0x8] sm:$0xff] %v190_v23  ;;  %v127_v24 = vpop.f32.mrb[1].mxu0 }
 0x15c   :  { %146 = vst [vmem:[#allocation2] sm:$0xff] %v127_v24 }
 0x15e   :  { %v193_v25 = vpop.f32.mrb[0].mxu1 }
 0x15f   :  { %149 = vst [vmem:[#allocation2 + $0x18] sm:$0xff] %v193_v25  ;;  %v137_v26 = vpop.f32.mrb[1].mxu1 }
 0x160   :  { %148 = vst [vmem:[#allocation2 + $0x10] sm:$0xff] %v137_v26 }
 0x161   :  { %218 = shalt.err (!%p215_p4)
}
 0x162   :  { %s219_s24 = scalar_lea.hbm %s283_s2, 512 }
 0x163   :  { %p220_p5 = scmp.ne.s32.totalorder %s283_s2, %s219_s24  ;;  %p223_p6 = scmp.lt.u32.totalorder %s219_s24, %s283_s2 }
 0x165   :  { %p225_p7 = pnand %p223_p6, %p220_p5 }
 0x167   :  { %228 = shalt.err (!%p225_p7)
}
 0x168   :  { %s234_s29 = smov 128   ;;  %s235_s30 = smov 8  }
 0x169   :  { %161 = dma.vmem_to_hbm [thread:$0]  %s156_s1, 512, %s283_s2, [#allocation3], %s234_s29, %s234_s29, %s235_s30  }
 0x16a   :  { %229 = dma.done.wait [#allocation3], 512  }
 0x16b   :  { %230 = vsyncadd [#allocation3], 4294966784 }
 0x16c   :  { %165 = vsyncpa [#allocation3], 1 }

// kernel: graph_unpool.1
= control target key start
LH: loop header
LB: loop body
LE: loop exit
PB: predicated region body
PF: predicated region fallthrough
CT: control target
= control target key end

     0   :  { %v231_v3 = vmov 0   ;;  %s281_s0 = inlined_call_operand.vmem [shape: s32[32,1], index: 0, kind: input, shape index: {}]   ;;  %s282_s1 = inlined_call_operand.vmem [shape: f32[16,128], index: 1, kind: input, shape index: {}]   ;;  %s283_s2 = inlined_call_operand.hbm [shape: f32[32,128], index: 2, kind: output, shape index: {}]  }
   0x1   :  { %v13_v0 = vld [vmem:[%s281_s0 + $0x8] sm:$0xff]  ;;  %v12_v1 = vld [vmem:[%s281_s0] sm:$0xff]  ;;  %v15_v2 = vld [vmem:[%s281_s0 + $0x18] sm:$0xff]  ;;  %206 = vset.pattern.permute.xlu1 %v231_v3  ;;  %205 = vset.pattern.permute.xlu0 %v231_v3 }
   0x2   :  { %v167_v4 = vadd.s32 4294967295, %v13_v0  ;;  %v166_v5 = vadd.s32 4294967295, %v12_v1  ;;  %v14_v6 = vld [vmem:[%s281_s0 + $0x10] sm:$0xff]  ;;  %v46_v7 = vld [vmem:[%s282_s1] sm:$0xff]  ;;  %v47_v8 = vld [vmem:[%s282_s1 + $0x8] sm:$0xff] }
   0x3   :  { %v194_v9 = vpack.c.bf16 %v47_v8, %v46_v7 }
   0x4   :  { %7 = vsyncpa [#allocation3], 0  ;;  %26 = vperm.xlu1 %206, %v167_v4   ;;  %23 = vperm.xlu0 %205, %v166_v5   ;;  %v169_v10 = vadd.s32 4294967295, %v15_v2  ;;  %v168_v11 = vadd.s32 4294967295, %v14_v6  ;;  %v20_v12 = vlaneseq  ;;  %vm48_vm0 = vcmask 130048   ;;  %s233_s0 = smov [#allocation2]  }
   0x5   :  { %195 = vmatprep.subr.bf16.mxu0 %v194_v9  ;;  %198 = vmatprep.subr.bf16.mxu1 %v194_v9  ;;  %v232_v16 = vmov 0.0   ;;  %s155_s1 = sshll.u32 %s233_s0, 4  ;;  %s156_s1 = int_to_ptr.vmem [resolvable:$true] %s155_s1 }
   0x6   :  { %197 = vmatpush3.bf16.msra.mxu0 %v194_v9  ;;  %199 = vmatpush3.bf16.msra.mxu1 %v194_v9  ;;  %v21_v13 = vand.u32 127, %v20_v12  ;;  %s207_s21 = scalar_lea.vmem %s156_s1, 512  ;;  %p212_p1 = scmp.lt.s32.totalorder %s156_s1, %s156_s1 }
   0x7   :  { %p208_p0 = scmp.ne.s32.totalorder %s156_s1, %s207_s21  ;;  %p213_p2 = scmp.lt.s32.totalorder %s207_s21, %s207_s21 }
   0x8   :  { %32 = vperm.xlu1 %206, %v169_v10   ;;  %29 = vperm.xlu0 %205, %v168_v11  }
   0x9   :  { %p214_p3 = por %p213_p2, %p212_p1 }
   0xb   :  { %p215_p4 = pnand %p214_p3, %p208_p0 }
  0x83   :  { %v27_v14 = vpop.permute.xlu1 %26  ;;  %v24_v15 = vpop.permute.xlu0 %23 }
  0x84   :  { %vm35_vm1 = vcmp.eq.s32.totalorder %v21_v13, %v27_v14  ;;  %vm34_vm2 = vcmp.eq.s32.totalorder %v21_v13, %v24_v15 }
  0x85   :  { %v171_v17 = vsel %vm35_vm1, 1.0, %v232_v16  ;;  %v170_v18 = vsel %vm34_vm2, 1.0, %v232_v16 }
  0x86   :  { %188 = vmatprep.mubr.msk.f32.mxu0 %vm48_vm0, %v170_v18 }
  0x87   :  { %v33_v19 = vpop.permute.xlu1 %32  ;;  %189 = vmatmul.mubr.msk.f32.vlgmr.msra.gmra.mrb[0].mxu0 %vm48_vm0, %v171_v17  ;;  %v30_v20 = vpop.permute.xlu0 %29 }
  0x88   :  { %vm37_vm3 = vcmp.eq.s32.totalorder %v21_v13, %v33_v19  ;;  %vm36_vm4 = vcmp.eq.s32.totalorder %v21_v13, %v30_v20 }
  0x89   :  { %v173_v21 = vsel %vm37_vm3, 1.0, %v232_v16  ;;  %v172_v22 = vsel %vm36_vm4, 1.0, %v232_v16 }
  0x8a   :  { %191 = vmatprep.mubr.msk.f32.mxu1 %vm48_vm0, %v172_v22 }
  0x8b   :  { %192 = vmatmul.mubr.msk.f32.vlgmr.msra.gmra.mrb[0].mxu1 %vm48_vm0, %v173_v21 }
 0x15a   :  { %v190_v23 = vpop.f32.mrb[0].mxu0 }
 0x15b   :  { %147 = vst [vmem:[#allocation2 + $0x8] sm:$0xff] %v190_v23  ;;  %v127_v24 = vpop.f32.mrb[1].mxu0 }
 0x15c   :  { %146 = vst [vmem:[#allocation2] sm:$0xff] %v127_v24 }
 0x15e   :  { %v193_v25 = vpop.f32.mrb[0].mxu1 }
 0x15f   :  { %149 = vst [vmem:[#allocation2 + $0x18] sm:$0xff] %v193_v25  ;;  %v137_v26 = vpop.f32.mrb[1].mxu1 }
 0x160   :  { %148 = vst [vmem:[#allocation2 + $0x10] sm:$0xff] %v137_v26 }
 0x161   :  { %218 = shalt.err (!%p215_p4)
}
 0x162   :  { %s219_s24 = scalar_lea.hbm %s283_s2, 512 }
 0x163   :  { %p220_p5 = scmp.ne.s32.totalorder %s283_s2, %s219_s24  ;;  %p223_p6 = scmp.lt.u32.totalorder %s219_s24, %s283_s2 }
 0x165   :  { %p225_p7 = pnand %p223_p6, %p220_p5 }
 0x167   :  { %228 = shalt.err (!%p225_p7)
}
 0x168   :  { %s234_s29 = smov 128   ;;  %s235_s30 = smov 8  }
 0x169   :  { %161 = dma.vmem_to_hbm [thread:$0]  %s156_s1, 512, %s283_s2, [#allocation3], %s234_s29, %s234_s29, %s235_s30  }
 0x16a   :  { %229 = dma.done.wait [#allocation3], 512  }
 0x16b   :  { %230 = vsyncadd [#allocation3], 4294966784 }
 0x16c   :  { %165 = vsyncpa [#allocation3], 1 }

</bundles_post_ra>
